<compile_context>
chip_gen: v5e
topology: v5e:2x2
jax: 0.10.0
libtpu: 0.0.40
codegen_flags: <defaults>
</compile_context>

<pallas_src>
import functools
import math

import jax
import jax.numpy as jnp
from jax import lax
from jax.experimental import pallas as pl
from jax.experimental.pallas import tpu as pltpu


# ----------------------------------------------------------------------------
# Kernel 1: per-pixel channel sum/max over concat([high, low]).
# grid = (N, pixel_tiles, channel_tiles); channel axis innermost, "arbitrary".
# Output block (1, 2, T) is the accumulator (revisited across channel tiles);
# row 0 holds the running sum (scaled to mean at the end), row 1 the max.
# ----------------------------------------------------------------------------
def _reduce_kernel(hi_ref, lo_ref, am_ref, *, inv_channels):
    ci = pl.program_id(2)
    n_c = pl.num_programs(2)

    hi = hi_ref[0]                                               # (TC, T)
    lo = lo_ref[0]                                               # (TC, T)
    blk_sum = (jnp.sum(hi, axis=0, keepdims=True)
               + jnp.sum(lo, axis=0, keepdims=True))             # (1, T)
    blk_max = jnp.maximum(jnp.max(hi, axis=0, keepdims=True),
                          jnp.max(lo, axis=0, keepdims=True))    # (1, T)

    @pl.when(ci == 0)
    def _():                                   # init from first channel tile
        am_ref[0, 0:1] = blk_sum
        am_ref[0, 1:2] = blk_max

    @pl.when(ci > 0)
    def _():                                   # accumulate
        am_ref[0, 0:1] = am_ref[0, 0:1] + blk_sum
        am_ref[0, 1:2] = jnp.maximum(am_ref[0, 1:2], blk_max)

    @pl.when(ci == n_c - 1)
    def _():                                   # finalize: sum -> mean
        am_ref[0, 0:1] = am_ref[0, 0:1] * inv_channels


# ----------------------------------------------------------------------------
# Kernel 2: weighted combine + 1x1 conv3 (single MXU matmul, K = dim/2) +
# multiply by x.  Flat (channels, pixels) tiles; pixel tile multiple of 128.
# ----------------------------------------------------------------------------
def _fuse_kernel(hi_ref, lo_ref, sig_ref, x_ref, w3_ref, b3_ref, out_ref):
    hi = hi_ref[0]                                    # (Cd2, T)
    lo = lo_ref[0]                                    # (Cd2, T)
    sg = sig_ref[0]                                   # (2,   T)
    hidden = hi * sg[0:1, :] + lo * sg[1:2, :]        # (Cd2, T)
    h3 = jnp.dot(w3_ref[...], hidden,
                 preferred_element_type=jnp.float32)  # (C, T)
    h3 = h3 + b3_ref[...]                             # (C, 1) lane-broadcast bias
    out_ref[0] = x_ref[0] * h3                        # elementwise gate by x


# ----------------------------------------------------------------------------
# Tile pickers (static, shape- and VMEM-budget derived).
# ----------------------------------------------------------------------------
def _pick_pixel_tile(hw, bytes_per_pixel, budget_bytes=24 << 20,
                     max_pixels=8192):
    """Largest multiple-of-128 divisor of hw, capped by max_pixels and a byte
    budget.  Falls back to the full flat image (block == full array dim)."""
    cap = min(max_pixels, max(128, budget_bytes // max(bytes_per_pixel, 1)))
    best = None
    t = 128
    while t <= min(hw, cap):
        if hw % t == 0:
            best = t
        t += 128
    return best if best is not None else hw


def _pick_channel_tile(cd2, t_pix, budget_bytes=16 << 20):
    """Largest multiple-of-8 divisor of cd2 such that 2 input streams x 2
    pipeline buffers of (tc, t_pix) f32 stay under budget (fits v7x VMEM)."""
    max_tc = budget_bytes // (2 * 2 * t_pix * 4)
    if cd2 <= max_tc or cd2 % 8 != 0:
        return cd2
    best = cd2
    for tc in range(8, int(min(cd2, max_tc)) + 1, 8):
        if cd2 % tc == 0:
            best = tc
    return best


def _vmem_limit(need_bytes):
    """Scoped VMEM limit derived from the actual block footprint + headroom."""
    return int(min(max(32 << 20, need_bytes + (8 << 20)), 100 << 20))


# ----------------------------------------------------------------------------
# Wrapper: NCHW in, NCHW out (matches nn.Module), no HBM transposes.
# ----------------------------------------------------------------------------
@jax.jit
def sff_pallas(high, low, x, params):
    conv_sq_w, conv_sq_b, w3, b3 = params
    n, cd2, h, w = high.shape
    c = x.shape[1]
    hw = h * w
    assert low.shape == high.shape
    assert x.shape == (n, c, h, w) and c == 2 * cd2

    # Free contiguous reshapes: lane-dense (channels, pixels) slabs.
    high2 = high.reshape(n, cd2, hw)
    low2 = low.reshape(n, cd2, hw)
    x2 = x.reshape(n, c, hw)

    # Shared pixel tile, sized by pass-2 per-pixel bytes (the larger pass).
    bytes_per_pixel = (2 * cd2 + 2 * c + 4) * 4 * 2      # double-buffered
    t = _pick_pixel_tile(hw, bytes_per_pixel)
    tc = _pick_channel_tile(cd2, t)

    # ---- pass 1: channel mean/max reduction (pure streaming) ---------------
    need1 = 2 * (2 * tc * t + 2 * t) * 4
    avgmax = pl.pallas_call(
        functools.partial(_reduce_kernel, inv_channels=1.0 / float(c)),
        out_shape=jax.ShapeDtypeStruct((n, 2, hw), jnp.float32),
        grid=(n, hw // t, cd2 // tc),
        in_specs=[
            pl.BlockSpec((1, tc, t), lambda i, j, k: (i, k, j)),       # high
            pl.BlockSpec((1, tc, t), lambda i, j, k: (i, k, j)),       # low
        ],
        out_specs=pl.BlockSpec((1, 2, t), lambda i, j, k: (i, 0, j)),
        compiler_params=pltpu.CompilerParams(
            dimension_semantics=("parallel", "parallel", "arbitrary"),
            vmem_limit_bytes=_vmem_limit(need1)),
    )(high2, low2)

    # ---- tiny 7x7 conv_squeeze + sigmoid: plain XLA (2*H*W per image) -------
    # Hoisted out of the kernels per perf review: keeps both Pallas passes
    # lane-dense and removes the unaligned-slice tail from the reduction.
    agg = avgmax.reshape(n, 2, h, w)
    sig = lax.conv_general_dilated(agg, conv_sq_w, (1, 1), ((3, 3), (3, 3)),
                                   dimension_numbers=("NCHW", "OIHW", "NCHW"))
    sig = jax.nn.sigmoid(sig + conv_sq_b[None, :, None, None])
    sig2 = sig.reshape(n, 2, hw)

    # ---- pass 2: combine + conv3 (matmul) + gate by x ------------------------
    need2 = 2 * ((2 * cd2 + 2 + 2 * c) * t) * 4 + (c * cd2 + c) * 4
    out2 = pl.pallas_call(
        _fuse_kernel,
        out_shape=jax.ShapeDtypeStruct((n, c, hw), jnp.float32),
        grid=(n, hw // t),
        in_specs=[
            pl.BlockSpec((1, cd2, t), lambda i, j: (i, 0, j)),         # high
            pl.BlockSpec((1, cd2, t), lambda i, j: (i, 0, j)),         # low
            pl.BlockSpec((1, 2, t), lambda i, j: (i, 0, j)),           # sig
            pl.BlockSpec((1, c, t), lambda i, j: (i, 0, j)),           # x
            pl.BlockSpec((c, cd2), lambda i, j: (0, 0)),               # w3
            pl.BlockSpec((c, 1), lambda i, j: (0, 0)),                 # b3
        ],
        out_specs=pl.BlockSpec((1, c, t), lambda i, j: (i, 0, j)),
        compiler_params=pltpu.CompilerParams(
            dimension_semantics=("parallel", "parallel"),
            vmem_limit_bytes=_vmem_limit(need2)),
    )(high2, low2, sig2, x2, w3, b3)

    return out2.reshape(n, c, h, w)


# ----------------------------------------------------------------------------
# Deterministic parameter construction (mirrors nn.Module __init__ shapes).
# ----------------------------------------------------------------------------
def make_params(key, dim):
    k1, k2, k3, k4 = jax.random.split(key, 4)
    # PyTorch-layout weights (OIHW) + biases.
    conv_sq_w = jax.random.normal(k1, (2, 2, 7, 7), jnp.float32) * 0.2
    conv_sq_b = jax.random.normal(k2, (2,), jnp.float32) * 0.1
    conv3_w = jax.random.normal(k3, (dim, dim // 2, 1, 1), jnp.float32) * (
        1.0 / math.sqrt(dim // 2))
    conv3_b = jax.random.normal(k4, (dim,), jnp.float32) * 0.1

    # Kernel-layout parameters.
    w3_mat = conv3_w[:, :, 0, 0]              # (dim, dim//2)
    b3_col = conv3_b[:, None]                 # (dim, 1)

    kernel_params = (conv_sq_w, conv_sq_b, w3_mat, b3_col)
    torch_params = (conv_sq_w, conv_sq_b, conv3_w, conv3_b)
    return kernel_params, torch_params


# ----------------------------------------------------------------------------
# Pure-JAX reference (matches the PyTorch forward) for checking.
# ----------------------------------------------------------------------------
def sff_reference(high, low, x, torch_params):
    conv_sq_w, conv_sq_b, conv3_w, conv3_b = torch_params
    out = jnp.concatenate([high, low], axis=1)
    avg = jnp.mean(out, axis=1, keepdims=True)
    mx = jnp.max(out, axis=1, keepdims=True)
    agg = jnp.concatenate([avg, mx], axis=1)
    sig = lax.conv_general_dilated(agg, conv_sq_w, (1, 1), ((3, 3), (3, 3)),
                                   dimension_numbers=("NCHW", "OIHW", "NCHW"))
    sig = jax.nn.sigmoid(sig + conv_sq_b[None, :, None, None])
    out = high * sig[:, 0:1] + low * sig[:, 1:2]
    out = lax.conv_general_dilated(out, conv3_w, (1, 1), ((0, 0), (0, 0)),
                                   dimension_numbers=("NCHW", "OIHW", "NCHW"))
    out = out + conv3_b[None, :, None, None]
    return x * out


if __name__ == "__main__":
    key = jax.random.PRNGKey(0)
    k_hi, k_lo, k_x, k_p = jax.random.split(key, 4)

    dim = 64
    N, H, W = 2, 16, 16

    high = jax.random.normal(k_hi, (N, dim // 2, H, W), jnp.float32)
    low = jax.random.normal(k_lo, (N, dim // 2, H, W), jnp.float32)
    x = jax.random.normal(k_x, (N, dim, H, W), jnp.float32)

    kernel_params, torch_params = make_params(k_p, dim)

    out = sff_pallas(high, low, x, kernel_params)
    out = jax.block_until_ready(out)

    ref = sff_reference(high, low, x, torch_params)
    assert out.shape == ref.shape == (N, dim, H, W)
    max_err = float(jnp.max(jnp.abs(out - ref)))
    assert jnp.allclose(out, ref, atol=2e-4, rtol=2e-4), f"max abs err {max_err}"
    print("KERNEL_OK")
</pallas_src>

<mosaic_0001>
module attributes {stable_mosaic.version = 11 : i64} {
  func.func @_reduce_kernel(%arg0: i32, %arg1: i32, %arg2: i32, %arg3: memref<1x32x256xf32, #tpu.memory_space<vmem>>, %arg4: memref<1x32x256xf32, #tpu.memory_space<vmem>>, %arg5: memref<1x2x256xf32, #tpu.memory_space<vmem>>) attributes {dimension_semantics = [#tpu.dimension_semantics<parallel>, #tpu.dimension_semantics<parallel>, #tpu.dimension_semantics<arbitrary>], iteration_bounds = array<i64: 2, 1, 1>, scalar_prefetch = 0 : i64, scratch_operands = 0 : i64, tpu.core_type = #tpu.core_type<tc>, window_params = [{transform_indices = @transform_0, window_bounds = array<i64: 1, 32, 256>}, {transform_indices = @transform_1, window_bounds = array<i64: 1, 32, 256>}, {transform_indices = @transform_2, window_bounds = array<i64: 1, 2, 256>}]} {
    %c0 = arith.constant 0 : index
    %c0_0 = arith.constant 0 : index
    %c0_1 = arith.constant 0 : index
    %0 = vector.load %arg3[%c0, %c0_0, %c0_1] : memref<1x32x256xf32, #tpu.memory_space<vmem>>, vector<1x32x256xf32>
    %1 = vector.shape_cast %0 : vector<1x32x256xf32> to vector<32x256xf32>
    %c0_2 = arith.constant 0 : index
    %c0_3 = arith.constant 0 : index
    %c0_4 = arith.constant 0 : index
    %2 = vector.load %arg4[%c0_2, %c0_3, %c0_4] : memref<1x32x256xf32, #tpu.memory_space<vmem>>, vector<1x32x256xf32>
    %3 = vector.shape_cast %2 : vector<1x32x256xf32> to vector<32x256xf32>
    %cst = arith.constant dense<0.000000e+00> : vector<256xf32>
    %4 = vector.multi_reduction <add>, %1, %cst [0] : vector<32x256xf32> to vector<256xf32>
    %5 = vector.shape_cast %4 : vector<256xf32> to vector<1x256xf32>
    %cst_5 = arith.constant dense<0.000000e+00> : vector<256xf32>
    %6 = vector.multi_reduction <add>, %3, %cst_5 [0] : vector<32x256xf32> to vector<256xf32>
    %7 = vector.shape_cast %6 : vector<256xf32> to vector<1x256xf32>
    %8 = arith.addf %5, %7 : vector<1x256xf32>
    %cst_6 = arith.constant dense<0xFF800000> : vector<256xf32>
    %9 = vector.multi_reduction <maximumf>, %1, %cst_6 [0] : vector<32x256xf32> to vector<256xf32>
    %10 = vector.shape_cast %9 : vector<256xf32> to vector<1x256xf32>
    %cst_7 = arith.constant dense<0xFF800000> : vector<256xf32>
    %11 = vector.multi_reduction <maximumf>, %3, %cst_7 [0] : vector<32x256xf32> to vector<256xf32>
    %12 = vector.shape_cast %11 : vector<256xf32> to vector<1x256xf32>
    %13 = arith.maximumf %10, %12 : vector<1x256xf32>
    %c0_i32 = arith.constant 0 : i32
    %14 = arith.cmpi eq, %arg2, %c0_i32 : i32
    %15 = arith.extui %14 : i1 to i32
    %c0_i32_8 = arith.constant 0 : i32
    %16 = arith.cmpi ne, %15, %c0_i32_8 : i32
    scf.if %16 {
      %c0_13 = arith.constant 0 : index
      %c0_14 = arith.constant 0 : index
      %c0_15 = arith.constant 0 : index
      %23 = vector.load %arg5[%c0_13, %c0_14, %c0_15] : memref<1x2x256xf32, #tpu.memory_space<vmem>>, vector<1x1x256xf32>
      %24 = vector.shape_cast %23 : vector<1x1x256xf32> to vector<1x256xf32>
      %25 = vector.shape_cast %8 : vector<1x256xf32> to vector<1x1x256xf32>
      tpu.vector_store %arg5[%c0_13, %c0_14, %c0_15], %25 {strides = array<i32>} : memref<1x2x256xf32, #tpu.memory_space<vmem>>, vector<1x1x256xf32>,
      %c0_16 = arith.constant 0 : index
      %c1 = arith.constant 1 : index
      %c0_17 = arith.constant 0 : index
      %26 = vector.load %arg5[%c0_16, %c1, %c0_17] : memref<1x2x256xf32, #tpu.memory_space<vmem>>, vector<1x1x256xf32>
      %27 = vector.shape_cast %26 : vector<1x1x256xf32> to vector<1x256xf32>
      %28 = vector.shape_cast %13 : vector<1x256xf32> to vector<1x1x256xf32>
      tpu.vector_store %arg5[%c0_16, %c1, %c0_17], %28 {strides = array<i32>} : memref<1x2x256xf32, #tpu.memory_space<vmem>>, vector<1x1x256xf32>,
    } else {
    }
    %c0_i32_9 = arith.constant 0 : i32
    %17 = arith.cmpi sgt, %arg2, %c0_i32_9 : i32
    %18 = arith.extui %17 : i1 to i32
    %c0_i32_10 = arith.constant 0 : i32
    %19 = arith.cmpi ne, %18, %c0_i32_10 : i32
    scf.if %19 {
      %c0_13 = arith.constant 0 : index
      %c0_14 = arith.constant 0 : index
      %c0_15 = arith.constant 0 : index
      %23 = vector.load %arg5[%c0_13, %c0_14, %c0_15] : memref<1x2x256xf32, #tpu.memory_space<vmem>>, vector<1x1x256xf32>
      %24 = vector.shape_cast %23 : vector<1x1x256xf32> to vector<1x256xf32>
      %25 = arith.addf %24, %8 : vector<1x256xf32>
      %c0_16 = arith.constant 0 : index
      %c0_17 = arith.constant 0 : index
      %c0_18 = arith.constant 0 : index
      %26 = vector.load %arg5[%c0_16, %c0_17, %c0_18] : memref<1x2x256xf32, #tpu.memory_space<vmem>>, vector<1x1x256xf32>
      %27 = vector.shape_cast %26 : vector<1x1x256xf32> to vector<1x256xf32>
      %28 = vector.shape_cast %25 : vector<1x256xf32> to vector<1x1x256xf32>
      tpu.vector_store %arg5[%c0_16, %c0_17, %c0_18], %28 {strides = array<i32>} : memref<1x2x256xf32, #tpu.memory_space<vmem>>, vector<1x1x256xf32>,
      %c0_19 = arith.constant 0 : index
      %c1 = arith.constant 1 : index
      %c0_20 = arith.constant 0 : index
      %29 = vector.load %arg5[%c0_19, %c1, %c0_20] : memref<1x2x256xf32, #tpu.memory_space<vmem>>, vector<1x1x256xf32>
      %30 = vector.shape_cast %29 : vector<1x1x256xf32> to vector<1x256xf32>
      %31 = arith.maximumf %30, %13 : vector<1x256xf32>
      %c0_21 = arith.constant 0 : index
      %c1_22 = arith.constant 1 : index
      %c0_23 = arith.constant 0 : index
      %32 = vector.load %arg5[%c0_21, %c1_22, %c0_23] : memref<1x2x256xf32, #tpu.memory_space<vmem>>, vector<1x1x256xf32>
      %33 = vector.shape_cast %32 : vector<1x1x256xf32> to vector<1x256xf32>
      %34 = vector.shape_cast %31 : vector<1x256xf32> to vector<1x1x256xf32>
      tpu.vector_store %arg5[%c0_21, %c1_22, %c0_23], %34 {strides = array<i32>} : memref<1x2x256xf32, #tpu.memory_space<vmem>>, vector<1x1x256xf32>,
    } else {
    }
    %c0_i32_11 = arith.constant 0 : i32
    %20 = arith.cmpi eq, %arg2, %c0_i32_11 : i32
    %21 = arith.extui %20 : i1 to i32
    %c0_i32_12 = arith.constant 0 : i32
    %22 = arith.cmpi ne, %21, %c0_i32_12 : i32
    scf.if %22 {
      %c0_13 = arith.constant 0 : index
      %c0_14 = arith.constant 0 : index
      %c0_15 = arith.constant 0 : index
      %23 = vector.load %arg5[%c0_13, %c0_14, %c0_15] : memref<1x2x256xf32, #tpu.memory_space<vmem>>, vector<1x1x256xf32>
      %24 = vector.shape_cast %23 : vector<1x1x256xf32> to vector<1x256xf32>
      %cst_16 = arith.constant 1.562500e-02 : f32
      %25 = vector.broadcast %cst_16 : f32 to vector<1x256xf32>
      %26 = arith.mulf %24, %25 : vector<1x256xf32>
      %c0_17 = arith.constant 0 : index
      %c0_18 = arith.constant 0 : index
      %c0_19 = arith.constant 0 : index
      %27 = vector.load %arg5[%c0_17, %c0_18, %c0_19] : memref<1x2x256xf32, #tpu.memory_space<vmem>>, vector<1x1x256xf32>
      %28 = vector.shape_cast %27 : vector<1x1x256xf32> to vector<1x256xf32>
      %29 = vector.shape_cast %26 : vector<1x256xf32> to vector<1x1x256xf32>
      tpu.vector_store %arg5[%c0_17, %c0_18, %c0_19], %29 {strides = array<i32>} : memref<1x2x256xf32, #tpu.memory_space<vmem>>, vector<1x1x256xf32>,
    } else {
    }
    return
  }
  func.func @transform_0(%arg0: i32, %arg1: i32, %arg2: i32) -> (i32, i32, i32) {
    %c0_i32 = arith.constant 0 : i32
    return %arg0, %arg2, %arg1 : i32, i32, i32
  }
  func.func @transform_1(%arg0: i32, %arg1: i32, %arg2: i32) -> (i32, i32, i32) {
    %c0_i32 = arith.constant 0 : i32
    return %arg0, %arg2, %arg1 : i32, i32, i32
  }
  func.func @transform_2(%arg0: i32, %arg1: i32, %arg2: i32) -> (i32, i32, i32) {
    %c0_i32 = arith.constant 0 : i32
    %c0_i32_0 = arith.constant 0 : i32
    return %arg0, %c0_i32, %arg1 : i32, i32, i32
  }
}

module attributes {stable_mosaic.version = 11 : i64} {
  func.func @_fuse_kernel(%arg0: i32, %arg1: i32, %arg2: memref<1x32x256xf32, #tpu.memory_space<vmem>>, %arg3: memref<1x32x256xf32, #tpu.memory_space<vmem>>, %arg4: memref<1x2x256xf32, #tpu.memory_space<vmem>>, %arg5: memref<1x64x256xf32, #tpu.memory_space<vmem>>, %arg6: memref<64x32xf32, #tpu.memory_space<vmem>>, %arg7: memref<64x1xf32, #tpu.memory_space<vmem>>, %arg8: memref<1x64x256xf32, #tpu.memory_space<vmem>>) attributes {dimension_semantics = [#tpu.dimension_semantics<parallel>, #tpu.dimension_semantics<parallel>], iteration_bounds = array<i64: 2, 1>, scalar_prefetch = 0 : i64, scratch_operands = 0 : i64, tpu.core_type = #tpu.core_type<tc>, window_params = [{transform_indices = @transform_0, window_bounds = array<i64: 1, 32, 256>}, {transform_indices = @transform_1, window_bounds = array<i64: 1, 32, 256>}, {transform_indices = @transform_2, window_bounds = array<i64: 1, 2, 256>}, {transform_indices = @transform_3, window_bounds = array<i64: 1, 64, 256>}, {pipeline_mode = #tpu.pipeline_mode<synchronous>, transform_indices = @transform_4, window_bounds = array<i64: 64, 32>}, {pipeline_mode = #tpu.pipeline_mode<synchronous>, transform_indices = @transform_5, window_bounds = array<i64: 64, 1>}, {transform_indices = @transform_6, window_bounds = array<i64: 1, 64, 256>}]} {
    %c0 = arith.constant 0 : index
    %c0_0 = arith.constant 0 : index
    %c0_1 = arith.constant 0 : index
    %0 = vector.load %arg2[%c0, %c0_0, %c0_1] : memref<1x32x256xf32, #tpu.memory_space<vmem>>, vector<1x32x256xf32>
    %1 = vector.shape_cast %0 : vector<1x32x256xf32> to vector<32x256xf32>
    %c0_2 = arith.constant 0 : index
    %c0_3 = arith.constant 0 : index
    %c0_4 = arith.constant 0 : index
    %2 = vector.load %arg3[%c0_2, %c0_3, %c0_4] : memref<1x32x256xf32, #tpu.memory_space<vmem>>, vector<1x32x256xf32>
    %3 = vector.shape_cast %2 : vector<1x32x256xf32> to vector<32x256xf32>
    %c0_5 = arith.constant 0 : index
    %c0_6 = arith.constant 0 : index
    %c0_7 = arith.constant 0 : index
    %4 = vector.load %arg4[%c0_5, %c0_6, %c0_7] : memref<1x2x256xf32, #tpu.memory_space<vmem>>, vector<1x2x256xf32>
    %5 = vector.shape_cast %4 : vector<1x2x256xf32> to vector<2x256xf32>
    %6 = vector.extract_strided_slice %5 {offsets = [0, 0], sizes = [1, 256], strides = [1, 1]} : vector<2x256xf32> to vector<1x256xf32>
    %7 = vector.broadcast %6 : vector<1x256xf32> to vector<32x256xf32>
    %8 = arith.mulf %1, %7 : vector<32x256xf32>
    %9 = vector.extract_strided_slice %5 {offsets = [1, 0], sizes = [1, 256], strides = [1, 1]} : vector<2x256xf32> to vector<1x256xf32>
    %10 = vector.broadcast %9 : vector<1x256xf32> to vector<32x256xf32>
    %11 = arith.mulf %3, %10 : vector<32x256xf32>
    %12 = arith.addf %8, %11 : vector<32x256xf32>
    %c0_8 = arith.constant 0 : index
    %c0_9 = arith.constant 0 : index
    %13 = vector.load %arg6[%c0_8, %c0_9] : memref<64x32xf32, #tpu.memory_space<vmem>>, vector<64x32xf32>
    %cst = arith.constant dense<0.000000e+00> : vector<64x256xf32>
    %14 = tpu.matmul %13, %12, %cst {dimension_numbers = #tpu.dot_dimension_numbers<[1], [0], [0], [1], [0, 0, 1, 1], [], []>} : vector<64x32xf32>, vector<32x256xf32>, vector<64x256xf32> -> vector<64x256xf32>
    %c0_10 = arith.constant 0 : index
    %c0_11 = arith.constant 0 : index
    %15 = vector.load %arg7[%c0_10, %c0_11] : memref<64x1xf32, #tpu.memory_space<vmem>>, vector<64x1xf32>
    %16 = vector.broadcast %15 : vector<64x1xf32> to vector<64x256xf32>
    %17 = arith.addf %14, %16 : vector<64x256xf32>
    %c0_12 = arith.constant 0 : index
    %c0_13 = arith.constant 0 : index
    %c0_14 = arith.constant 0 : index
    %18 = vector.load %arg5[%c0_12, %c0_13, %c0_14] : memref<1x64x256xf32, #tpu.memory_space<vmem>>, vector<1x64x256xf32>
    %19 = vector.shape_cast %18 : vector<1x64x256xf32> to vector<64x256xf32>
    %20 = arith.mulf %19, %17 : vector<64x256xf32>
    %c0_15 = arith.constant 0 : index
    %c0_16 = arith.constant 0 : index
    %c0_17 = arith.constant 0 : index
    %21 = vector.load %arg8[%c0_15, %c0_16, %c0_17] : memref<1x64x256xf32, #tpu.memory_space<vmem>>, vector<1x64x256xf32>
    %22 = vector.shape_cast %21 : vector<1x64x256xf32> to vector<64x256xf32>
    %23 = vector.shape_cast %20 : vector<64x256xf32> to vector<1x64x256xf32>
    tpu.vector_store %arg8[%c0_15, %c0_16, %c0_17], %23 {strides = array<i32>} : memref<1x64x256xf32, #tpu.memory_space<vmem>>, vector<1x64x256xf32>,
    return
  }
  func.func @transform_0(%arg0: i32, %arg1: i32) -> (i32, i32, i32) {
    %c0_i32 = arith.constant 0 : i32
    %c0_i32_0 = arith.constant 0 : i32
    return %arg0, %c0_i32, %arg1 : i32, i32, i32
  }
  func.func @transform_1(%arg0: i32, %arg1: i32) -> (i32, i32, i32) {
    %c0_i32 = arith.constant 0 : i32
    %c0_i32_0 = arith.constant 0 : i32
    return %arg0, %c0_i32, %arg1 : i32, i32, i32
  }
  func.func @transform_2(%arg0: i32, %arg1: i32) -> (i32, i32, i32) {
    %c0_i32 = arith.constant 0 : i32
    %c0_i32_0 = arith.constant 0 : i32
    return %arg0, %c0_i32, %arg1 : i32, i32, i32
  }
  func.func @transform_3(%arg0: i32, %arg1: i32) -> (i32, i32, i32) {
    %c0_i32 = arith.constant 0 : i32
    %c0_i32_0 = arith.constant 0 : i32
    return %arg0, %c0_i32, %arg1 : i32, i32, i32
  }
  func.func @transform_4(%arg0: i32, %arg1: i32) -> (i32, i32) {
    %c0_i32 = arith.constant 0 : i32
    %c0_i32_0 = arith.constant 0 : i32
    %c0_i32_1 = arith.constant 0 : i32
    return %c0_i32, %c0_i32_0 : i32, i32
  }
  func.func @transform_5(%arg0: i32, %arg1: i32) -> (i32, i32) {
    %c0_i32 = arith.constant 0 : i32
    %c0_i32_0 = arith.constant 0 : i32
    %c0_i32_1 = arith.constant 0 : i32
    return %c0_i32, %c0_i32_0 : i32, i32
  }
  func.func @transform_6(%arg0: i32, %arg1: i32) -> (i32, i32, i32) {
    %c0_i32 = arith.constant 0 : i32
    %c0_i32_0 = arith.constant 0 : i32
    return %arg0, %c0_i32, %arg1 : i32, i32, i32
  }
}

</mosaic_0001>

<bundles_post_ra>
// kernel: sff_pallas.2
= control target key start
LH: loop header
LB: loop body
LE: loop exit
PB: predicated region body
PF: predicated region fallthrough
CT: control target
= control target key end

     0   :  { %s616_s9 = smov 0   ;;  %s618_s10 = smov 0   ;;  %s656_s0 = inlined_call_operand.vmem [shape: f32[2,32,256], index: 0, kind: input, shape index: {}]   ;;  %s657_s1 = inlined_call_operand.vmem [shape: f32[2,32,256], index: 1, kind: input, shape index: {}]   ;;  %s658_s2 = inlined_call_operand.vmem [shape: f32[2,2,256], index: 2, kind: output, shape index: {}]  }
   0x1   :  { %s620_s11 = smov 0  }
   0x2 LB: > { %s31_s12 = sadd.s32 1, %s595_s10  ;;  %p538_p0 = scmp.ge.s32.totalorder %s599_s11, 1  ;;  %s599_s11 = sphi %s620_s11, %s12_s11   ;;  %s595_s10 = sphi %s618_s10, %s660_s10   ;;  %s591_s9 = sphi %s616_s9, %s659_s9  }
   0x3   : > { %p33_p1 = scmp.ge.s32.totalorder %s31_s12, 2  ;;  %p173_p2 = scmp.lt.s32.totalorder %s599_s11, 3 }
   0x5   : > { %s662_s12 = smov (%p33_p1, %s31_s12), 0  ;;  %p174_p3 = pnand %p538_p0, %p173_p2 }
   0x6   : > { %p224_p4 = scmp.lt.s32.totalorder (!%p174_p3), %s591_s9, 1 }
   0x7   : > { %177 = sbr.rel (%p174_p3) target bundleno = 53 (0x35), region = 28 }
   0xc   : > { %s664_s9 = smov (!%p224_p4, %s591_s9), 1  ;;  %vm363_vm0 = vcmask 1040384  }
   0xd   : > { %s550_s13 = sshll.u32 %s664_s9, 6  ;;  %s552_s20 = sshll.u32 %s664_s9, 2 }
   0xe   : > { %s235_s16 = scalar_lea.vmem %s656_s0, %s550_s13  ;;  %s251_s19 = scalar_lea.vmem %s657_s1, %s550_s13 }
   0xf   : > { %v264_v0 = vld [vmem:[%s235_s16] sm:$0xff]  ;;  %v265_v1 = vld [vmem:[%s235_s16 + $0x8] sm:$0xff]  ;;  %v266_v2 = vld [vmem:[%s235_s16 + $0x10] sm:$0xff]  ;;  %s262_s23 = scalar_lea.vmem %s658_s2, %s552_s20 }
  0x10   : > { %v267_v3 = vld [vmem:[%s235_s16 + $0x18] sm:$0xff]  ;;  %v268_v4 = vld [vmem:[%s235_s16 + $0x20] sm:$0xff]  ;;  %v269_v5 = vld [vmem:[%s235_s16 + $0x28] sm:$0xff]  ;;  %v280_v6 = vadd.f32 %v266_v2, %v264_v0 }
  0x11   : > { %v270_v7 = vld [vmem:[%s235_s16 + $0x30] sm:$0xff]  ;;  %v271_v8 = vld [vmem:[%s235_s16 + $0x38] sm:$0xff]  ;;  %v272_v9 = vld [vmem:[%s251_s19] sm:$0xff]  ;;  %v289_v10 = vadd.f32 %v267_v3, %v265_v1  ;;  %v318_v11 = vmax.f32 %v264_v0, %v268_v4  ;;  %v327_v12 = vmax.f32 %v265_v1, %v269_v5 }
  0x12   : > { %v273_v13 = vld [vmem:[%s251_s19 + $0x8] sm:$0xff]  ;;  %v274_v14 = vld [vmem:[%s251_s19 + $0x10] sm:$0xff]  ;;  %v275_v15 = vld [vmem:[%s251_s19 + $0x18] sm:$0xff]  ;;  %v281_v16 = vadd.f32 %v280_v6, %v268_v4  ;;  %v319_v17 = vmax.f32 %v266_v2, %v270_v7  ;;  %v328_v18 = vmax.f32 %v267_v3, %v271_v8 }
  0x13   : > { %v276_v19 = vld [vmem:[%s251_s19 + $0x20] sm:$0xff]  ;;  %v277_v20 = vld [vmem:[%s251_s19 + $0x28] sm:$0xff]  ;;  %v290_v21 = vadd.f32 %v289_v10, %v269_v5  ;;  %v298_v22 = vadd.f32 %v274_v14, %v272_v9  ;;  %v307_v23 = vadd.f32 %v275_v15, %v273_v13  ;;  %v278_v24 = vld [vmem:[%s251_s19 + $0x30] sm:$0xff] }
  0x14   : > { %v279_v25 = vld [vmem:[%s251_s19 + $0x38] sm:$0xff]  ;;  %v282_v26 = vadd.f32 %v281_v16, %v270_v7  ;;  %v320_v27 = vmax.f32 %v318_v11, %v319_v17  ;;  %v329_v28 = vmax.f32 %v327_v12, %v328_v18  ;;  %v336_v29 = vmax.f32 %v272_v9, %v276_v19 }
  0x15   : > { %v291_v30 = vadd.f32 %v290_v21, %v271_v8  ;;  %v299_v31 = vadd.f32 %v298_v22, %v276_v19  ;;  %v308_v32 = vadd.f32 %v307_v23, %v277_v20  ;;  %v337_v33 = vmax.f32 %v274_v14, %v278_v24 }
  0x16   : > { %v283_v34 = vrot.slane %v282_v26, 4  ;;  %v321_v35 = vrot.slane %v320_v27, 4  ;;  %v330_v36 = vrot.slane %v329_v28, 4  ;;  %v345_v37 = vmax.f32 %v273_v13, %v277_v20 }
  0x17   : > { %v292_v38 = vrot.slane %v291_v30, 4  ;;  %v300_v39 = vadd.f32 %v299_v31, %v278_v24  ;;  %v309_v40 = vadd.f32 %v308_v32, %v279_v25  ;;  %v338_v41 = vmax.f32 %v336_v29, %v337_v33 }
  0x18   : > { %v284_v42 = vadd.f32 %v283_v34, %v282_v26  ;;  %v322_v43 = vmax.f32 %v320_v27, %v321_v35  ;;  %v331_v44 = vmax.f32 %v329_v28, %v330_v36  ;;  %v346_v45 = vmax.f32 %v275_v15, %v279_v25 }
  0x19   : > { %v293_v46 = vadd.f32 %v292_v38, %v291_v30  ;;  %v301_v47 = vrot.slane %v300_v39, 4  ;;  %v310_v48 = vrot.slane %v309_v40, 4  ;;  %v339_v49 = vrot.slane %v338_v41, 4 }
  0x1a   : > { %v285_v50 = vrot.slane %v284_v42, 2  ;;  %v323_v51 = vrot.slane %v322_v43, 2  ;;  %v332_v52 = vrot.slane %v331_v44, 2  ;;  %v347_v53 = vmax.f32 %v345_v37, %v346_v45 }
  0x1b   : > { %v294_v54 = vrot.slane %v293_v46, 2  ;;  %v302_v55 = vadd.f32 %v301_v47, %v300_v39  ;;  %v311_v56 = vadd.f32 %v310_v48, %v309_v40  ;;  %v340_v57 = vmax.f32 %v338_v41, %v339_v49 }
  0x1c   : > { %v286_v58 = vadd.f32 %v285_v50, %v284_v42  ;;  %v324_v59 = vmax.f32 %v322_v43, %v323_v51  ;;  %v333_v60 = vmax.f32 %v331_v44, %v332_v52  ;;  %v348_v61 = vrot.slane %v347_v53, 4 }
  0x1d   : > { %v295_v62 = vadd.f32 %v294_v54, %v293_v46  ;;  %v303_v63 = vrot.slane %v302_v55, 2  ;;  %v312_v0 = vrot.slane %v311_v56, 2  ;;  %v341_v1 = vrot.slane %v340_v57, 2 }
  0x1e   : > { %v287_v2 = vrot.slane %v286_v58, 1  ;;  %v349_v3 = vmax.f32 %v347_v53, %v348_v61  ;;  %v325_v9 = vrot.slane %v324_v59, 1  ;;  %v334_v10 = vrot.slane %v333_v60, 1 }
  0x1f   : > { %v296_v4 = vrot.slane %v295_v62, 1  ;;  %v304_v5 = vadd.f32 %v303_v63, %v302_v55  ;;  %v313_v6 = vadd.f32 %v312_v0, %v311_v56  ;;  %v342_v7 = vmax.f32 %v340_v57, %v341_v1 }
  0x20   : > { %v288_v8 = vadd.f32 %v287_v2, %v286_v58  ;;  %v350_v11 = vrot.slane %v349_v3, 2  ;;  %v366_v19 = vlaneseq  ;;  %v326_v20 = vmax.f32 %v324_v59, %v325_v9 }
  0x21   : > { %v297_v12 = vadd.f32 %v296_v4, %v295_v62  ;;  %v305_v13 = vrot.slane %v304_v5, 1  ;;  %v314_v14 = vrot.slane %v313_v6, 1  ;;  %v343_v15 = vrot.slane %v342_v7, 1 }
  0x22   : > { %v351_v16 = vmax.f32 %v349_v3, %v350_v11  ;;  %v335_v21 = vmax.f32 %v333_v60, %v334_v10  ;;  %vm368_vm1 = vcmp.lt.s32.totalorder %v366_v19, 256 }
  0x23   : > { %v306_v17 = vadd.f32 %v305_v13, %v304_v5  ;;  %v315_v18 = vadd.f32 %v314_v14, %v313_v6  ;;  %v344_v22 = vmax.f32 %v342_v7, %v343_v15 }
  0x24   : > { %v352_v23 = vrot.slane %v351_v16, 1 }
  0x25   : > { %v316_v24 = vadd.f32 %v306_v17, %v288_v8  ;;  %v317_v25 = vadd.f32 %v315_v18, %v297_v12  ;;  %v354_v28 = vmax.f32 %v326_v20, %v344_v22 }
  0x26   : > { %v353_v26 = vmax.f32 %v351_v16, %v352_v23 }
  0x27   : > { %v362_v27 = vrot.slane %v317_v25, 7 }
  0x28   : > { %v355_v29 = vmax.f32 %v335_v21, %v353_v26 }
  0x29   : > { %v364_v30 = vsel %vm363_vm0, %v316_v24, %v362_v27 }
  0x2a   : > { %370 = vst.msk [vmem:[%s262_s23] ss:$2 sm:$0x3] %vm368_vm1, %v364_v30  ;;  %v373_v31 = vrot.slane %v355_v29, 7 }
  0x2c   : > { %v374_v32 = vsel %vm363_vm0, %v354_v28, %v373_v31 }
  0x2d   : > { %545 = vst.msk [vmem:[%s262_s23 + $0x1] ss:$2 sm:$0x3] %vm368_vm1, %v374_v32 }
  0x31   : > { %v407_v33 = vld [vmem:[%s262_s23] ss:$2 sm:$0x3] }
  0x32   : > { %v408_v34 = vmul.f32 0.015625, %v407_v33 }
  0x34   : > { %413 = vst.msk [vmem:[%s262_s23] ss:$2 sm:$0x3] %vm368_vm1, %v408_v34 }
  0x35 PF: > { %s12_s11 = sadd.s32 1, %s599_s11   ;;  %s659_s9 = smov %s595_s10 }
  0x36   : > { %p9_p5 = scmp.ge.s32.totalorder %s12_s11, 4   ;;  %s660_s10 = smov %s662_s12 }
  0x38   :  { %11 = sbr.rel (!%p9_p5) target bundleno = 2 (0x2), region = 75 }

// kernel: sff_pallas.3
= control target key start
LH: loop header
LB: loop body
LE: loop exit
PB: predicated region body
PF: predicated region fallthrough
CT: control target
= control target key end

     0   :  { %s939_s21 = smov 0   ;;  %s941_s22 = smov 0   ;;  %s1106_s0 = inlined_call_operand.vmem [shape: f32[2,32,256], index: 0, kind: input, shape index: {}]   ;;  %s1107_s1 = inlined_call_operand.vmem [shape: f32[2,32,256], index: 1, kind: input, shape index: {}]   ;;  %s1108_s2 = inlined_call_operand.vmem [shape: f32[2,2,256], index: 2, kind: input, shape index: {}]   ;;  %s1109_s3 = inlined_call_operand.vmem [shape: f32[2,64,256], index: 3, kind: input, shape index: {}]   ;;  %s1110_s4 = inlined_call_operand.vmem [shape: f32[64,32], index: 4, kind: input, shape index: {}]   ;;  %s1111_s5 = inlined_call_operand.vmem [shape: f32[64,1], index: 5, kind: input, shape index: {}]   ;;  %s1112_s6 = inlined_call_operand.vmem [shape: f32[2,64,256], index: 6, kind: output, shape index: {}]  }
   0x1   :  { %s943_s23 = smov 0  }
   0x2 LB: > { %s28_s24 = sadd.s32 1, %s897_s22  ;;  %p809_p0 = scmp.ge.s32.totalorder %s901_s23, 1  ;;  %s901_s23 = sphi %s943_s23, %s16_s23   ;;  %s897_s22 = sphi %s941_s22, %s1114_s22   ;;  %s893_s21 = sphi %s939_s21, %s1113_s21  }
   0x3   : > { %p30_p1 = scmp.ge.s32.totalorder %s28_s24, 2  ;;  %p284_p2 = scmp.lt.s32.totalorder %s901_s23, 3 }
   0x5   : > { %s1116_s24 = smov (%p30_p1, %s28_s24), 0  ;;  %p285_p3 = pnand %p809_p0, %p284_p2 }
   0x6   : > { %p350_p4 = scmp.lt.s32.totalorder (!%p285_p3), %s893_s21, 1 }
   0x7   : > { %288 = sbr.rel (%p285_p3) target bundleno = 195 (0xc3), region = 44 }
   0xc   : > { %v903_v0 = vmov 0   ;;  %v463_v1 = vld [vmem:[%s1111_s5 + $0x10] sm:$0xff]  ;;  %v461_v2 = vld [vmem:[%s1111_s5] sm:$0xff]  ;;  %s1118_s21 = smov (!%p350_p4, %s893_s21), 1  ;;  %v464_v28 = vld [vmem:[%s1111_s5 + $0x18] sm:$0xff]  ;;  %vm509_vm0 = vcmask 261120  }
   0xd   : > { %877 = vset.pattern.permute.xlu1 %v903_v0  ;;  %876 = vset.pattern.permute.xlu0 %v903_v0  ;;  %s838_s29 = sshll.u32 %s1118_s21, 6  ;;  %s840_s30 = sshll.u32 %s1118_s21, 2  ;;  %v462_v35 = vld [vmem:[%s1111_s5 + $0x8] sm:$0xff]  ;;  %v453_v54 = vld [vmem:[%s1110_s4] sm:$0xff]  ;;  %v468_v56 = vld [vmem:[%s1111_s5 + $0x38] sm:$0xff] }
   0xe   : > { %481 = vperm.xlu1 %877, %v463_v1   ;;  %471 = vperm.xlu0 %876, %v461_v2   ;;  %s970_s9 = scalar_lea.vmem %s1106_s0, %s838_s29  ;;  %s975_s12 = scalar_lea.vmem %s1107_s1, %s838_s29  ;;  %v457_v55 = vld [vmem:[%s1110_s4 + $0x20] sm:$0xff]  ;;  %v467_v57 = vld [vmem:[%s1111_s5 + $0x30] sm:$0xff]  ;;  %v454_v59 = vld [vmem:[%s1110_s4 + $0x8] sm:$0xff] }
   0xf   : > { %878 = vset.pattern.permute.xlu2 %v903_v0  ;;  %s377_s15 = scalar_lea.vmem %s1108_s2, %s840_s30  ;;  %v405_v3 = vld [vmem:[%s970_s9 + $0x30] sm:$0xff]  ;;  %v406_v8 = vld [vmem:[%s970_s9 + $0x38] sm:$0xff]  ;;  %v403_v12 = vld [vmem:[%s970_s9 + $0x20] sm:$0xff]  ;;  %s841_s28 = sshll.u32 %s1118_s21, 7 }
  0x10   : > { %v415_v4 = vld [vmem:[%s377_s15] sm:$0xf]  ;;  %v413_v5 = vld [vmem:[%s975_s12 + $0x30] sm:$0xff]  ;;  %v414_v11 = vld [vmem:[%s975_s12 + $0x38] sm:$0xff]  ;;  %s1058_s7 = scalar_lea.vmem %s1109_s3, %s841_s28  ;;  %s1065_s21 = scalar_lea.vmem %s1112_s6, %s841_s28 }
  0x11   : > { %v417_v6 = vperm.slane %v415_v4, 0  ;;  %v431_v7 = vperm.slane %v415_v4, 1  ;;  %v418_v9 = vperm.slane %v415_v4, 2  ;;  %v432_v10 = vperm.slane %v415_v4, 3  ;;  %v411_v13 = vld [vmem:[%s975_s12 + $0x20] sm:$0xff]  ;;  %v404_v18 = vld [vmem:[%s970_s9 + $0x28] sm:$0xff] }
  0x12   : > { %v412_v19 = vld [vmem:[%s975_s12 + $0x28] sm:$0xff]  ;;  %v401_v20 = vld [vmem:[%s970_s9 + $0x10] sm:$0xff]  ;;  %v402_v26 = vld [vmem:[%s970_s9 + $0x18] sm:$0xff] }
  0x13   : > { %v421_v14 = vperm.slane %v417_v6, 0  ;;  %v435_v15 = vperm.slane %v431_v7, 1  ;;  %v422_v16 = vperm.slane %v418_v9, 0  ;;  %v436_v17 = vperm.slane %v432_v10, 1  ;;  %v409_v21 = vld [vmem:[%s975_s12 + $0x10] sm:$0xff]  ;;  %v410_v27 = vld [vmem:[%s975_s12 + $0x18] sm:$0xff] }
  0x14   : > { %v399_v33 = vld [vmem:[%s970_s9] sm:$0xff]  ;;  %v400_v40 = vld [vmem:[%s970_s9 + $0x8] sm:$0xff]  ;;  %v455_v62 = vld [vmem:[%s1110_s4 + $0x10] sm:$0xff] }
  0x15   : > { %v429_v22 = vmul.f32 %v421_v14, %v405_v3  ;;  %v443_v23 = vmul.f32 %v435_v15, %v413_v5  ;;  %v430_v24 = vmul.f32 %v422_v16, %v406_v8  ;;  %v444_v25 = vmul.f32 %v436_v17, %v414_v11  ;;  %v407_v34 = vld [vmem:[%s975_s12] sm:$0xff]  ;;  %v408_v41 = vld [vmem:[%s975_s12 + $0x8] sm:$0xff]  ;;  %v459_v63 = vld [vmem:[%s1110_s4 + $0x30] sm:$0xff] }
  0x16   : > { %v427_v29 = vmul.f32 %v421_v14, %v403_v12  ;;  %v441_v30 = vmul.f32 %v435_v15, %v411_v13  ;;  %v428_v31 = vmul.f32 %v422_v16, %v404_v18  ;;  %v442_v32 = vmul.f32 %v436_v17, %v412_v19  ;;  %486 = vperm.xlu1 %877, %v464_v28   ;;  %v465_v58 = vld [vmem:[%s1111_s5 + $0x20] sm:$0xff]  ;;  %v458_v60 = vld [vmem:[%s1110_s4 + $0x28] sm:$0xff]  ;;  %v456_v0 = vld [vmem:[%s1110_s4 + $0x18] sm:$0xff] }
  0x17   : > { %v451_v36 = vadd.f32 %v443_v23, %v429_v22  ;;  %v452_v37 = vadd.f32 %v444_v25, %v430_v24  ;;  %v425_v38 = vmul.f32 %v421_v14, %v401_v20  ;;  %v439_v39 = vmul.f32 %v435_v15, %v409_v21  ;;  %476 = vperm.xlu0 %876, %v462_v35   ;;  %v466_v61 = vld [vmem:[%s1111_s5 + $0x28] sm:$0xff]  ;;  %v460_v1 = vld [vmem:[%s1110_s4 + $0x38] sm:$0xff]  ;;  %v616_v4 = vld [vmem:[%s1058_s7] sm:$0xff] }
  0x18   : > { %v449_v42 = vadd.f32 %v441_v30, %v427_v29  ;;  %v450_v43 = vadd.f32 %v442_v32, %v428_v31  ;;  %v426_v44 = vmul.f32 %v422_v16, %v402_v26  ;;  %v440_v45 = vmul.f32 %v436_v17, %v410_v27  ;;  %491 = vperm.xlu2 %878, %v465_v58   ;;  %v617_v7 = vld [vmem:[%s1058_s7 + $0x8] sm:$0xff]  ;;  %v624_v13 = vld [vmem:[%s1058_s7 + $0x40] sm:$0xff]  ;;  %v618_v20 = vld [vmem:[%s1058_s7 + $0x10] sm:$0xff] }
  0x19   : > { %546 = vmatpush.msra.mxu0 %v451_v36  ;;  %843 = vmatpush.msra.mxu2 %v451_v36  ;;  %v447_v46 = vadd.f32 %v439_v39, %v425_v38  ;;  %v423_v47 = vmul.f32 %v421_v14, %v399_v33  ;;  %v437_v48 = vmul.f32 %v435_v15, %v407_v34  ;;  %v619_v24 = vld [vmem:[%s1058_s7 + $0x18] sm:$0xff]  ;;  %v626_v32 = vld [vmem:[%s1058_s7 + $0x50] sm:$0xff]  ;;  %v620_v38 = vld [vmem:[%s1058_s7 + $0x20] sm:$0xff] }
  0x1a   : > { %587 = vmatpush.msra.mxu1 %v452_v37  ;;  %847 = vmatpush.msra.mxu3 %v452_v37  ;;  %v448_v49 = vadd.f32 %v440_v45, %v426_v44  ;;  %v424_v50 = vmul.f32 %v422_v16, %v400_v40  ;;  %v438_v51 = vmul.f32 %v436_v17, %v408_v41  ;;  %v625_v16 = vld [vmem:[%s1058_s7 + $0x48] sm:$0xff]  ;;  %v627_v35 = vld [vmem:[%s1058_s7 + $0x58] sm:$0xff] }
  0x1b   : > { %547 = vmatpush.msra.mxu0 %v449_v42  ;;  %844 = vmatpush.msra.mxu2 %v449_v42  ;;  %v445_v52 = vadd.f32 %v437_v48, %v423_v47  ;;  %v621_v42 = vld [vmem:[%s1058_s7 + $0x28] sm:$0xff] }
  0x1c   : > { %588 = vmatpush.msra.mxu1 %v450_v43  ;;  %848 = vmatpush.msra.mxu3 %v450_v43  ;;  %v446_v53 = vadd.f32 %v438_v51, %v424_v50  ;;  %v628_v50 = vld [vmem:[%s1058_s7 + $0x60] sm:$0xff] }
  0x1d   : > { %548 = vmatpush.msra.mxu0 %v447_v46  ;;  %845 = vmatpush.msra.mxu2 %v447_v46 }
  0x1e   : > { %589 = vmatpush.msra.mxu1 %v448_v49  ;;  %849 = vmatpush.msra.mxu3 %v448_v49 }
  0x1f   : > { %549 = vmatpush.msra.mxu0 %v445_v52  ;;  %846 = vmatpush.msra.mxu2 %v445_v52 }
  0x20   : > { %590 = vmatpush.msra.mxu1 %v446_v53  ;;  %850 = vmatpush.msra.mxu3 %v446_v53  ;;  %v629_v53 = vld [vmem:[%s1058_s7 + $0x68] sm:$0xff] }
  0x21   : > { %820 = vmatmul.msk.f32.vlgmr.msra.gmra.mxu0 %vm509_vm0, %v453_v54  ;;  %824 = vmatmul.msk.f32.vlgmr.msra.gmra.mxu2 %vm509_vm0, %v457_v55 }
  0x22   : > { %828 = vmatmul.msk.f32.vlgmr.msra.gmra.mxu1 %vm509_vm0, %v453_v54  ;;  %832 = vmatmul.msk.f32.vlgmr.msra.gmra.mxu3 %vm509_vm0, %v457_v55 }
  0x23   : > { %506 = vperm.xlu1 %877, %v468_v56   ;;  %501 = vperm.xlu0 %876, %v467_v57   ;;  %v622_v56 = vld [vmem:[%s1058_s7 + $0x30] sm:$0xff] }
  0x24   : > { %496 = vperm.xlu2 %878, %v466_v61  }
  0x29   : > { %821 = vmatmul.msk.f32.gmra.mxu0 %vm509_vm0, %v454_v59  ;;  %825 = vmatmul.msk.f32.gmra.mxu2 %vm509_vm0, %v458_v60 }
  0x2a   : > { %829 = vmatmul.msk.f32.gmra.mxu1 %vm509_vm0, %v454_v59  ;;  %833 = vmatmul.msk.f32.gmra.mxu3 %vm509_vm0, %v458_v60  ;;  %v623_v60 = vld [vmem:[%s1058_s7 + $0x38] sm:$0xff] }
  0x31   : > { %822 = vmatmul.msk.f32.gmra.mxu0 %vm509_vm0, %v455_v62  ;;  %826 = vmatmul.msk.f32.gmra.mxu2 %vm509_vm0, %v459_v63 }
  0x32   : > { %830 = vmatmul.msk.f32.gmra.mxu1 %vm509_vm0, %v455_v62  ;;  %834 = vmatmul.msk.f32.gmra.mxu3 %vm509_vm0, %v459_v63 }
  0x39   : > { %823 = vmatmul.msk.f32.gmra.mxu0 %vm509_vm0, %v456_v0  ;;  %827 = vmatmul.msk.f32.gmra.mxu2 %vm509_vm0, %v460_v1 }
  0x3a   : > { %831 = vmatmul.msk.f32.gmra.mxu1 %vm509_vm0, %v456_v0  ;;  %835 = vmatmul.msk.f32.gmra.mxu3 %vm509_vm0, %v460_v1 }
  0x72   : > { %v492_v9 = vpop.permute.xlu2 %491 }
  0x7e   : > { %v497_v30 = vpop.permute.xlu2 %496 }
  0x80   : > { %v472_v2 = vpop.permute.xlu0 %471  ;;  %v482_v25 = vpop.permute.xlu1 %481 }
  0x88   : > { %v487_v46 = vpop.permute.xlu1 %486 }
  0x89   : > { %v477_v17 = vpop.permute.xlu0 %476 }
  0x95   : > { %v502_v48 = vpop.permute.xlu0 %501  ;;  %v507_v1 = vpop.permute.xlu1 %506 }
  0x9e   : > { %v551_v3 = vpop.f32.mrf.mxu0 }
  0x9f   : > { %v552_v5 = vadd.f32 %v551_v3, %v472_v2  ;;  %v592_v6 = vpop.f32.mrf.mxu1  ;;  %v630_v3 = vld [vmem:[%s1058_s7 + $0x70] sm:$0xff] }
  0xa0   : > { %v593_v8 = vadd.f32 %v592_v6, %v472_v2  ;;  %v631_v6 = vld [vmem:[%s1058_s7 + $0x78] sm:$0xff] }
  0xa1   : > { %v632_v10 = vmul.f32 %v616_v4, %v552_v5 }
  0xa2   : > { %v633_v11 = vmul.f32 %v617_v7, %v593_v8 }
  0xa3   : > { %648 = vst [vmem:[%s1065_s21] sm:$0xff] %v632_v10 }
  0xa4   : > { %649 = vst [vmem:[%s1065_s21 + $0x8] sm:$0xff] %v633_v11  ;;  %v563_v12 = vpop.f32.mrf.mxu2 }
  0xa5   : > { %v564_v14 = vadd.f32 %v563_v12, %v492_v9  ;;  %v604_v15 = vpop.f32.mrf.mxu3 }
  0xa6   : > { %v605_v18 = vadd.f32 %v604_v15, %v492_v9  ;;  %v554_v19 = vpop.f32.mrf.mxu0 }
  0xa7   : > { %v640_v21 = vmul.f32 %v624_v13, %v564_v14  ;;  %v555_v22 = vadd.f32 %v554_v19, %v477_v17  ;;  %v595_v23 = vpop.f32.mrf.mxu1 }
  0xa8   : > { %v641_v26 = vmul.f32 %v625_v16, %v605_v18  ;;  %v596_v27 = vadd.f32 %v595_v23, %v477_v17 }
  0xa9   : > { %656 = vst [vmem:[%s1065_s21 + $0x40] sm:$0xff] %v640_v21  ;;  %v634_v28 = vmul.f32 %v618_v20, %v555_v22 }
  0xaa   : > { %657 = vst [vmem:[%s1065_s21 + $0x48] sm:$0xff] %v641_v26  ;;  %v635_v29 = vmul.f32 %v619_v24, %v596_v27 }
  0xab   : > { %650 = vst [vmem:[%s1065_s21 + $0x10] sm:$0xff] %v634_v28 }
  0xac   : > { %651 = vst [vmem:[%s1065_s21 + $0x18] sm:$0xff] %v635_v29  ;;  %v566_v31 = vpop.f32.mrf.mxu2 }
  0xad   : > { %v567_v33 = vadd.f32 %v566_v31, %v497_v30  ;;  %v607_v34 = vpop.f32.mrf.mxu3 }
  0xae   : > { %v608_v36 = vadd.f32 %v607_v34, %v497_v30  ;;  %v557_v37 = vpop.f32.mrf.mxu0 }
  0xaf   : > { %v642_v39 = vmul.f32 %v626_v32, %v567_v33  ;;  %v558_v40 = vadd.f32 %v557_v37, %v482_v25  ;;  %v598_v41 = vpop.f32.mrf.mxu1 }
  0xb0   : > { %v643_v43 = vmul.f32 %v627_v35, %v608_v36  ;;  %v599_v44 = vadd.f32 %v598_v41, %v482_v25 }
  0xb1   : > { %658 = vst [vmem:[%s1065_s21 + $0x50] sm:$0xff] %v642_v39  ;;  %v636_v45 = vmul.f32 %v620_v38, %v558_v40 }
  0xb2   : > { %659 = vst [vmem:[%s1065_s21 + $0x58] sm:$0xff] %v643_v43  ;;  %v637_v47 = vmul.f32 %v621_v42, %v599_v44 }
  0xb3   : > { %652 = vst [vmem:[%s1065_s21 + $0x20] sm:$0xff] %v636_v45 }
  0xb4   : > { %653 = vst [vmem:[%s1065_s21 + $0x28] sm:$0xff] %v637_v47  ;;  %v569_v49 = vpop.f32.mrf.mxu2 }
  0xb5   : > { %v570_v51 = vadd.f32 %v569_v49, %v502_v48  ;;  %v610_v52 = vpop.f32.mrf.mxu3 }
  0xb6   : > { %v611_v54 = vadd.f32 %v610_v52, %v502_v48  ;;  %v560_v55 = vpop.f32.mrf.mxu0 }
  0xb7   : > { %v644_v57 = vmul.f32 %v628_v50, %v570_v51  ;;  %v561_v58 = vadd.f32 %v560_v55, %v487_v46  ;;  %v601_v59 = vpop.f32.mrf.mxu1 }
  0xb8   : > { %v645_v61 = vmul.f32 %v629_v53, %v611_v54  ;;  %v602_v62 = vadd.f32 %v601_v59, %v487_v46 }
  0xb9   : > { %660 = vst [vmem:[%s1065_s21 + $0x60] sm:$0xff] %v644_v57  ;;  %v638_v63 = vmul.f32 %v622_v56, %v561_v58 }
  0xba   : > { %661 = vst [vmem:[%s1065_s21 + $0x68] sm:$0xff] %v645_v61  ;;  %v639_v0 = vmul.f32 %v623_v60, %v602_v62 }
  0xbb   : > { %654 = vst [vmem:[%s1065_s21 + $0x30] sm:$0xff] %v638_v63 }
  0xbc   : > { %655 = vst [vmem:[%s1065_s21 + $0x38] sm:$0xff] %v639_v0  ;;  %v572_v2 = vpop.f32.mrf.mxu2 }
  0xbd   : > { %v573_v4 = vadd.f32 %v572_v2, %v507_v1  ;;  %v613_v5 = vpop.f32.mrf.mxu3 }
  0xbe   : > { %v614_v7 = vadd.f32 %v613_v5, %v507_v1 }
  0xbf   : > { %v646_v8 = vmul.f32 %v630_v3, %v573_v4 }
  0xc0   : > { %v647_v9 = vmul.f32 %v631_v6, %v614_v7 }
  0xc1   : > { %662 = vst [vmem:[%s1065_s21 + $0x70] sm:$0xff] %v646_v8 }
  0xc2   : > { %663 = vst [vmem:[%s1065_s21 + $0x78] sm:$0xff] %v647_v9 }
  0xc3 PF: > { %s16_s23 = sadd.s32 1, %s901_s23   ;;  %s1113_s21 = smov %s897_s22 }
  0xc4   : > { %p13_p5 = scmp.ge.s32.totalorder %s16_s23, 4   ;;  %s1114_s22 = smov %s1116_s24 }
  0xc6   :  { %15 = sbr.rel (!%p13_p5) target bundleno = 2 (0x2), region = 83 }

</bundles_post_ra>
